<compile_context>
chip_gen: v5e
topology: v5e:2x2
jax: 0.10.0
libtpu: 0.0.40
codegen_flags: <defaults>
</compile_context>

<pallas_src>
import math
import jax
import jax.numpy as jnp
from jax.experimental import pallas as pl
from jax.experimental.pallas import tpu as pltpu

# --- model dimensions implied by the hard-coded slice 186:1751 -------------
MOF_LO, MOF_HI = 186, 1751
D_IN_TOTAL = MOF_HI              # x must have >= 1751 features
D_IN = MOF_HI - MOF_LO           # 1565  (MoFNet1 in_dims)
T1 = 128                         # MoFNet1 out_dims
H1 = MOF_LO                      # 186   (forced by the concat)
H2 = 64
H3 = 32
D_OUT = 4
BATCH = 8


def _round_up(n, m):
    return ((n + m - 1) // m) * m


X_PAD = _round_up(MOF_HI, 128)        # 1792  (padded feature width of x)
FRONT_PAD = 256                       # x[:, 0:256] block used for MoFNet2
H1_PAD = _round_up(H1, 128)           # 256   (padded MoFNet2 output width)
A2_DIM = FRONT_PAD + T1               # 384   (packed MoFNet2 contraction dim)
WS_ROWS = H1_PAD + H2 + H3            # 352   (packed small-weight buffer rows)

# bias pack: every bias starts at a 128-aligned lane offset
B1_OFF, B2_OFF, B2L_OFF, B3L_OFF, B4L_OFF = 0, 128, 384, 512, 640
BIAS_W = 768


# --------------------------------------------------------------------------
# Pallas kernel: whole forward pass on one batch tile.
# Inputs: x tile (bf16), m1 (bf16), m2 pack (bf16), small-weight pack (bf16),
#         bias pack (f32).  All matmuls bf16 x bf16 -> f32 accumulation.
# --------------------------------------------------------------------------
def net_kernel(x_ref, m1_ref, m2_ref, ws_ref, bias_ref, y_ref):
    xb = x_ref[...]                                            # (TB, 1792) bf16
    wdt = xb.dtype

    # ---- biases (packed, 128-aligned lane offsets, f32) ----
    b1 = bias_ref[:, B1_OFF:B1_OFF + T1]                       # (1, 128)
    b2 = bias_ref[:, B2_OFF:B2_OFF + H1_PAD]                   # (1, 256)
    b2l = bias_ref[:, B2L_OFF:B2L_OFF + H2]                    # (1, 64)
    b3l = bias_ref[:, B3L_OFF:B3L_OFF + H3]                    # (1, 32)
    b4l = bias_ref[:, B4L_OFF:B4L_OFF + D_OUT]                 # (1, 4)

    # ---- MoFNet1: t1 = relu( x @ m1_full + b1 )  (m1 rows outside [186:1751]
    #      are zero, so the whole padded x can be contracted directly) ----
    t1 = jnp.dot(xb, m1_ref[...], preferred_element_type=jnp.float32) + b1
    t1 = jnp.maximum(t1, 0.0)                                  # (TB, 128) f32

    # ---- MoFNet2 without concat: split matmul against the packed m2.
    #      rows [0:256] of m2 pair with x[:, 0:256] (rows 186:256 are zero),
    #      rows [256:384] pair with t1. ----
    h1 = (jnp.dot(xb[:, 0:FRONT_PAD], m2_ref[0:FRONT_PAD, :],
                  preferred_element_type=jnp.float32)
          + jnp.dot(t1.astype(wdt), m2_ref[FRONT_PAD:A2_DIM, :],
                    preferred_element_type=jnp.float32)
          + b2)
    h1 = jnp.maximum(h1, 0.0)                                  # (TB, 256) f32
    # TODO(synk): Dropout is stochastic; treated as identity (eval/inference).

    # ---- linear2 / linear3 / linear4 (pre-transposed, packed, bf16) ----
    w2t = ws_ref[0:H1_PAD, :]                                  # (256, 64)
    w3t = ws_ref[H1_PAD:H1_PAD + H2, 0:H3]                     # (64, 32)
    w4t = ws_ref[H1_PAD + H2:WS_ROWS, 0:D_OUT]                 # (32, 4)

    h2 = jnp.maximum(
        jnp.dot(h1.astype(wdt), w2t, preferred_element_type=jnp.float32) + b2l,
        0.0)
    h3 = jnp.maximum(
        jnp.dot(h2.astype(wdt), w3t, preferred_element_type=jnp.float32) + b3l,
        0.0)
    logits = jnp.dot(h3.astype(wdt), w4t,
                     preferred_element_type=jnp.float32) + b4l
    y_ref[...] = jax.nn.sigmoid(logits)


# --------------------------------------------------------------------------
# One-time parameter prep: fuse masks, transpose, pad, pack, cast to bf16.
# --------------------------------------------------------------------------
def prepare_params(p):
    wdt = jnp.bfloat16

    # MoFNet1 fused matrix (W1.T * adj1), embedded at rows [186:1751] of a
    # 1792-row matrix so the whole padded x can be contracted against it.
    m1 = p["w1"].T * p["adj1"]                                  # (1565, 128)
    m1_full = jnp.zeros((X_PAD, T1), jnp.float32)
    m1_full = m1_full.at[MOF_LO:MOF_HI, :].set(m1).astype(wdt)

    # MoFNet2 fused matrix (W2.T * adj2), packed for [x[:,0:256] ; t1]:
    # rows 0:186 <- front block, rows 186:256 <- 0, rows 256:384 <- t1 block.
    # Output columns padded 186 -> 256 with zeros.
    m2 = p["w2"].T * p["adj2"]                                  # (314, 186)
    m2_pack = jnp.zeros((A2_DIM, H1_PAD), jnp.float32)
    m2_pack = m2_pack.at[0:MOF_LO, 0:H1].set(m2[0:MOF_LO])
    m2_pack = m2_pack.at[FRONT_PAD:FRONT_PAD + T1, 0:H1].set(m2[MOF_LO:])
    m2_pack = m2_pack.astype(wdt)

    # Small weights packed into one bf16 buffer (linear2 K padded 186 -> 256).
    ws = jnp.zeros((WS_ROWS, H2), jnp.float32)
    ws = ws.at[0:H1, 0:H2].set(p["w2l"].T)
    ws = ws.at[H1_PAD:H1_PAD + H2, 0:H3].set(p["w3l"].T)
    ws = ws.at[H1_PAD + H2:WS_ROWS, 0:D_OUT].set(p["w4l"].T)
    ws = ws.astype(wdt)

    # All biases packed into one f32 row at 128-aligned lane offsets.
    bias = jnp.zeros((1, BIAS_W), jnp.float32)
    bias = bias.at[:, B1_OFF:B1_OFF + T1].set(p["b1"])
    bias = bias.at[:, B2_OFF:B2_OFF + H1].set(p["b2"])
    bias = bias.at[:, B2L_OFF:B2L_OFF + H2].set(p["b2l"])
    bias = bias.at[:, B3L_OFF:B3L_OFF + H3].set(p["b3l"])
    bias = bias.at[:, B4L_OFF:B4L_OFF + D_OUT].set(p["b4l"])

    return {"m1": m1_full, "m2": m2_pack, "ws": ws, "bias": bias}


# --------------------------------------------------------------------------
# Wrapper: single pad+cast of x, batched grid with VMEM-resident weights.
# --------------------------------------------------------------------------
def net_forward(x, prep, *, max_batch_tile=256):
    B = x.shape[0]
    x = x[:, :MOF_HI]
    # batch padded to a multiple of 16 (bf16 sublane packing); one pad op.
    TB = min(_round_up(B, 16), max_batch_tile)
    B_pad = _round_up(B, TB)
    xp = jnp.pad(x, ((0, B_pad - B), (0, X_PAD - MOF_HI))).astype(prep["m1"].dtype)

    grid = (B_pad // TB,)
    y = pl.pallas_call(
        net_kernel,
        out_shape=jax.ShapeDtypeStruct((B_pad, D_OUT), jnp.float32),
        grid=grid,
        in_specs=[
            pl.BlockSpec((TB, X_PAD), lambda i: (i, 0)),        # x tile
            pl.BlockSpec((X_PAD, T1), lambda i: (0, 0)),        # m1  (resident)
            pl.BlockSpec((A2_DIM, H1_PAD), lambda i: (0, 0)),   # m2  (resident)
            pl.BlockSpec((WS_ROWS, H2), lambda i: (0, 0)),      # w2/w3/w4 pack
            pl.BlockSpec((1, BIAS_W), lambda i: (0, 0)),        # bias pack
        ],
        out_specs=pl.BlockSpec((TB, D_OUT), lambda i: (i, 0)),
        compiler_params=pltpu.CompilerParams(
            dimension_semantics=("parallel",)),
    )(xp, prep["m1"], prep["m2"], prep["ws"], prep["bias"])
    return y[:B]


# --------------------------------------------------------------------------
# Deterministic parameter init (mirrors kaiming_uniform(a=sqrt(5)) bounds:
# weight/bias ~ U(-1/sqrt(fan_in), 1/sqrt(fan_in)))
# --------------------------------------------------------------------------
def init_params(key):
    def lin(key, out_d, in_d):
        kw, kb = jax.random.split(key)
        bound = 1.0 / math.sqrt(in_d)
        w = jax.random.uniform(kw, (out_d, in_d), jnp.float32, -bound, bound)
        b = jax.random.uniform(kb, (1, out_d), jnp.float32, -bound, bound)
        return w, b

    keys = jax.random.split(key, 6)
    params = {}
    params["w1"], params["b1"] = lin(keys[0], T1, D_IN)
    params["w2"], params["b2"] = lin(keys[1], H1, T1 + H1)
    params["w2l"], params["b2l"] = lin(keys[2], H2, H1)
    params["w3l"], params["b3l"] = lin(keys[3], H3, H2)
    params["w4l"], params["b4l"] = lin(keys[4], D_OUT, H3)
    ka1, ka2 = jax.random.split(keys[5])
    params["adj1"] = jax.random.bernoulli(ka1, 0.5, (D_IN, T1)).astype(jnp.float32)
    params["adj2"] = jax.random.bernoulli(ka2, 0.5, (T1 + H1, H1)).astype(jnp.float32)
    return params


# --------------------------------------------------------------------------
# Pure-JAX references
# --------------------------------------------------------------------------
def net_reference(x, p):
    """Exact f32 forward of the original module."""
    hi = jax.lax.Precision.HIGHEST
    t1 = jnp.maximum(
        jnp.dot(x[:, MOF_LO:MOF_HI], p["w1"].T * p["adj1"], precision=hi) + p["b1"], 0.0)
    x2 = jnp.concatenate([x[:, 0:MOF_LO], t1], axis=1)
    h1 = jnp.maximum(jnp.dot(x2, p["w2"].T * p["adj2"], precision=hi) + p["b2"], 0.0)
    h2 = jnp.maximum(jnp.dot(h1, p["w2l"].T, precision=hi) + p["b2l"], 0.0)
    h3 = jnp.maximum(jnp.dot(h2, p["w3l"].T, precision=hi) + p["b3l"], 0.0)
    return jax.nn.sigmoid(jnp.dot(h3, p["w4l"].T, precision=hi) + p["b4l"])


def net_reference_prepared(x, prep):
    """Same math as the kernel on the packed/padded bf16 params (XLA)."""
    wdt = prep["m1"].dtype
    B = x.shape[0]
    B_pad = _round_up(B, 16)
    xp = jnp.pad(x[:, :MOF_HI],
                 ((0, B_pad - B), (0, X_PAD - MOF_HI))).astype(wdt)
    bias = prep["bias"]
    b1 = bias[:, B1_OFF:B1_OFF + T1]
    b2 = bias[:, B2_OFF:B2_OFF + H1_PAD]
    b2l = bias[:, B2L_OFF:B2L_OFF + H2]
    b3l = bias[:, B3L_OFF:B3L_OFF + H3]
    b4l = bias[:, B4L_OFF:B4L_OFF + D_OUT]

    t1 = jnp.maximum(
        jnp.dot(xp, prep["m1"], preferred_element_type=jnp.float32) + b1, 0.0)
    h1 = jnp.maximum(
        jnp.dot(xp[:, 0:FRONT_PAD], prep["m2"][0:FRONT_PAD],
                preferred_element_type=jnp.float32)
        + jnp.dot(t1.astype(wdt), prep["m2"][FRONT_PAD:A2_DIM],
                  preferred_element_type=jnp.float32)
        + b2, 0.0)
    ws = prep["ws"]
    w2t = ws[0:H1_PAD]
    w3t = ws[H1_PAD:H1_PAD + H2, 0:H3]
    w4t = ws[H1_PAD + H2:WS_ROWS, 0:D_OUT]
    h2 = jnp.maximum(
        jnp.dot(h1.astype(wdt), w2t, preferred_element_type=jnp.float32) + b2l, 0.0)
    h3 = jnp.maximum(
        jnp.dot(h2.astype(wdt), w3t, preferred_element_type=jnp.float32) + b3l, 0.0)
    y = jax.nn.sigmoid(
        jnp.dot(h3.astype(wdt), w4t, preferred_element_type=jnp.float32) + b4l)
    return y[:B]


if __name__ == "__main__":
    key = jax.random.PRNGKey(0)
    kx, kp = jax.random.split(key)
    x = jax.random.normal(kx, (BATCH, D_IN_TOTAL), jnp.float32)
    params = init_params(kp)
    prep = prepare_params(params)

    fwd = jax.jit(net_forward)
    y = jax.block_until_ready(fwd(x, prep))

    assert y.shape == (BATCH, D_OUT)
    assert bool(jnp.all(jnp.isfinite(y)))

    # Tight check: kernel == identical packed/bf16 math evaluated by plain XLA.
    y_prep = net_reference_prepared(x, prep)
    assert bool(jnp.allclose(y, y_prep, atol=2e-3, rtol=2e-3))

    # Loose check: kernel ~= exact f32 module forward (bf16 weight/operand error).
    y_exact = net_reference(x, params)
    assert bool(jnp.allclose(y, y_exact, atol=2e-2, rtol=2e-2))

    print("KERNEL_OK")
</pallas_src>

<mosaic_0001>
module attributes {stable_mosaic.version = 11 : i64} {
  func.func @net_kernel(%arg0: i32, %arg1: memref<16x1792xbf16, #tpu.memory_space<vmem>>, %arg2: memref<1792x128xbf16, #tpu.memory_space<vmem>>, %arg3: memref<384x256xbf16, #tpu.memory_space<vmem>>, %arg4: memref<352x64xbf16, #tpu.memory_space<vmem>>, %arg5: memref<1x768xf32, #tpu.memory_space<vmem>>, %arg6: memref<16x4xf32, #tpu.memory_space<vmem>>) attributes {dimension_semantics = [#tpu.dimension_semantics<parallel>], iteration_bounds = array<i64: 1>, scalar_prefetch = 0 : i64, scratch_operands = 0 : i64, tpu.core_type = #tpu.core_type<tc>, window_params = [{transform_indices = @transform_0, window_bounds = array<i64: 16, 1792>}, {pipeline_mode = #tpu.pipeline_mode<synchronous>, transform_indices = @transform_1, window_bounds = array<i64: 1792, 128>}, {pipeline_mode = #tpu.pipeline_mode<synchronous>, transform_indices = @transform_2, window_bounds = array<i64: 384, 256>}, {pipeline_mode = #tpu.pipeline_mode<synchronous>, transform_indices = @transform_3, window_bounds = array<i64: 352, 64>}, {pipeline_mode = #tpu.pipeline_mode<synchronous>, transform_indices = @transform_4, window_bounds = array<i64: 1, 768>}, {transform_indices = @transform_5, window_bounds = array<i64: 16, 4>}]} {
    %c0 = arith.constant 0 : index
    %c0_0 = arith.constant 0 : index
    %0 = vector.load %arg1[%c0, %c0_0] : memref<16x1792xbf16, #tpu.memory_space<vmem>>, vector<16x1792xbf16>
    %c0_1 = arith.constant 0 : index
    %c0_2 = arith.constant 0 : index
    %1 = vector.load %arg5[%c0_1, %c0_2] : memref<1x768xf32, #tpu.memory_space<vmem>>, vector<1x128xf32>
    %c0_3 = arith.constant 0 : index
    %c128 = arith.constant 128 : index
    %2 = vector.load %arg5[%c0_3, %c128] : memref<1x768xf32, #tpu.memory_space<vmem>>, vector<1x256xf32>
    %c0_4 = arith.constant 0 : index
    %c384 = arith.constant 384 : index
    %3 = vector.load %arg5[%c0_4, %c384] : memref<1x768xf32, #tpu.memory_space<vmem>>, vector<1x64xf32>
    %c0_5 = arith.constant 0 : index
    %c512 = arith.constant 512 : index
    %4 = vector.load %arg5[%c0_5, %c512] : memref<1x768xf32, #tpu.memory_space<vmem>>, vector<1x32xf32>
    %c0_6 = arith.constant 0 : index
    %c640 = arith.constant 640 : index
    %5 = vector.load %arg5[%c0_6, %c640] : memref<1x768xf32, #tpu.memory_space<vmem>>, vector<1x4xf32>
    %c0_7 = arith.constant 0 : index
    %c0_8 = arith.constant 0 : index
    %6 = vector.load %arg2[%c0_7, %c0_8] : memref<1792x128xbf16, #tpu.memory_space<vmem>>, vector<1792x128xbf16>
    %cst = arith.constant dense<0.000000e+00> : vector<16x128xf32>
    %7 = tpu.matmul %0, %6, %cst {dimension_numbers = #tpu.dot_dimension_numbers<[1], [0], [0], [1], [0, 0, 1, 1], [], []>} : vector<16x1792xbf16>, vector<1792x128xbf16>, vector<16x128xf32> -> vector<16x128xf32>
    %8 = vector.broadcast %1 : vector<1x128xf32> to vector<16x128xf32>
    %9 = arith.addf %7, %8 : vector<16x128xf32>
    %cst_9 = arith.constant 0.000000e+00 : f32
    %10 = vector.broadcast %cst_9 : f32 to vector<16x128xf32>
    %11 = arith.maximumf %9, %10 : vector<16x128xf32>
    %12 = vector.extract_strided_slice %0 {offsets = [0, 0], sizes = [16, 256], strides = [1, 1]} : vector<16x1792xbf16> to vector<16x256xbf16>
    %c0_10 = arith.constant 0 : index
    %c0_11 = arith.constant 0 : index
    %13 = vector.load %arg3[%c0_10, %c0_11] : memref<384x256xbf16, #tpu.memory_space<vmem>>, vector<256x256xbf16>
    %cst_12 = arith.constant dense<0.000000e+00> : vector<16x256xf32>
    %14 = tpu.matmul %12, %13, %cst_12 {dimension_numbers = #tpu.dot_dimension_numbers<[1], [0], [0], [1], [0, 0, 1, 1], [], []>} : vector<16x256xbf16>, vector<256x256xbf16>, vector<16x256xf32> -> vector<16x256xf32>
    %15 = arith.truncf %11 : vector<16x128xf32> to vector<16x128xbf16>
    %c256 = arith.constant 256 : index
    %c0_13 = arith.constant 0 : index
    %16 = vector.load %arg3[%c256, %c0_13] : memref<384x256xbf16, #tpu.memory_space<vmem>>, vector<128x256xbf16>
    %cst_14 = arith.constant dense<0.000000e+00> : vector<16x256xf32>
    %17 = tpu.matmul %15, %16, %cst_14 {dimension_numbers = #tpu.dot_dimension_numbers<[1], [0], [0], [1], [0, 0, 1, 1], [], []>} : vector<16x128xbf16>, vector<128x256xbf16>, vector<16x256xf32> -> vector<16x256xf32>
    %18 = arith.addf %14, %17 : vector<16x256xf32>
    %19 = vector.broadcast %2 : vector<1x256xf32> to vector<16x256xf32>
    %20 = arith.addf %18, %19 : vector<16x256xf32>
    %cst_15 = arith.constant 0.000000e+00 : f32
    %21 = vector.broadcast %cst_15 : f32 to vector<16x256xf32>
    %22 = arith.maximumf %20, %21 : vector<16x256xf32>
    %c0_16 = arith.constant 0 : index
    %c0_17 = arith.constant 0 : index
    %23 = vector.load %arg4[%c0_16, %c0_17] : memref<352x64xbf16, #tpu.memory_space<vmem>>, vector<256x64xbf16>
    %c256_18 = arith.constant 256 : index
    %c0_19 = arith.constant 0 : index
    %24 = vector.load %arg4[%c256_18, %c0_19] : memref<352x64xbf16, #tpu.memory_space<vmem>>, vector<64x32xbf16>
    %c320 = arith.constant 320 : index
    %c0_20 = arith.constant 0 : index
    %25 = vector.load %arg4[%c320, %c0_20] : memref<352x64xbf16, #tpu.memory_space<vmem>>, vector<32x4xbf16>
    %26 = arith.truncf %22 : vector<16x256xf32> to vector<16x256xbf16>
    %cst_21 = arith.constant dense<0.000000e+00> : vector<16x64xf32>
    %27 = tpu.matmul %26, %23, %cst_21 {dimension_numbers = #tpu.dot_dimension_numbers<[1], [0], [0], [1], [0, 0, 1, 1], [], []>} : vector<16x256xbf16>, vector<256x64xbf16>, vector<16x64xf32> -> vector<16x64xf32>
    %28 = vector.broadcast %3 : vector<1x64xf32> to vector<16x64xf32>
    %29 = arith.addf %27, %28 : vector<16x64xf32>
    %cst_22 = arith.constant 0.000000e+00 : f32
    %30 = vector.broadcast %cst_22 : f32 to vector<16x64xf32>
    %31 = arith.maximumf %29, %30 : vector<16x64xf32>
    %32 = arith.truncf %31 : vector<16x64xf32> to vector<16x64xbf16>
    %cst_23 = arith.constant dense<0.000000e+00> : vector<16x32xf32>
    %33 = tpu.matmul %32, %24, %cst_23 {dimension_numbers = #tpu.dot_dimension_numbers<[1], [0], [0], [1], [0, 0, 1, 1], [], []>} : vector<16x64xbf16>, vector<64x32xbf16>, vector<16x32xf32> -> vector<16x32xf32>
    %34 = vector.broadcast %4 : vector<1x32xf32> to vector<16x32xf32>
    %35 = arith.addf %33, %34 : vector<16x32xf32>
    %cst_24 = arith.constant 0.000000e+00 : f32
    %36 = vector.broadcast %cst_24 : f32 to vector<16x32xf32>
    %37 = arith.maximumf %35, %36 : vector<16x32xf32>
    %38 = arith.truncf %37 : vector<16x32xf32> to vector<16x32xbf16>
    %cst_25 = arith.constant dense<0.000000e+00> : vector<16x4xf32>
    %39 = tpu.matmul %38, %25, %cst_25 {dimension_numbers = #tpu.dot_dimension_numbers<[1], [0], [0], [1], [0, 0, 1, 1], [], []>} : vector<16x32xbf16>, vector<32x4xbf16>, vector<16x4xf32> -> vector<16x4xf32>
    %40 = vector.broadcast %5 : vector<1x4xf32> to vector<16x4xf32>
    %41 = arith.addf %39, %40 : vector<16x4xf32>
    %42 = arith.negf %41 : vector<16x4xf32>
    %43 = math.exp %42 : vector<16x4xf32>
    %cst_26 = arith.constant 1.000000e+00 : f32
    %44 = vector.broadcast %cst_26 : f32 to vector<16x4xf32>
    %45 = arith.addf %44, %43 : vector<16x4xf32>
    %46 = arith.divf %44, %45 : vector<16x4xf32>
    %c0_27 = arith.constant 0 : index
    %c0_28 = arith.constant 0 : index
    %47 = vector.load %arg6[%c0_27, %c0_28] : memref<16x4xf32, #tpu.memory_space<vmem>>, vector<16x4xf32>
    tpu.vector_store %arg6[%c0_27, %c0_28], %46 {strides = array<i32>} : memref<16x4xf32, #tpu.memory_space<vmem>>, vector<16x4xf32>,
    return
  }
  func.func @transform_0(%arg0: i32) -> (i32, i32) {
    %c0_i32 = arith.constant 0 : i32
    %c0_i32_0 = arith.constant 0 : i32
    return %arg0, %c0_i32 : i32, i32
  }
  func.func @transform_1(%arg0: i32) -> (i32, i32) {
    %c0_i32 = arith.constant 0 : i32
    %c0_i32_0 = arith.constant 0 : i32
    %c0_i32_1 = arith.constant 0 : i32
    return %c0_i32, %c0_i32_0 : i32, i32
  }
  func.func @transform_2(%arg0: i32) -> (i32, i32) {
    %c0_i32 = arith.constant 0 : i32
    %c0_i32_0 = arith.constant 0 : i32
    %c0_i32_1 = arith.constant 0 : i32
    return %c0_i32, %c0_i32_0 : i32, i32
  }
  func.func @transform_3(%arg0: i32) -> (i32, i32) {
    %c0_i32 = arith.constant 0 : i32
    %c0_i32_0 = arith.constant 0 : i32
    %c0_i32_1 = arith.constant 0 : i32
    return %c0_i32, %c0_i32_0 : i32, i32
  }
  func.func @transform_4(%arg0: i32) -> (i32, i32) {
    %c0_i32 = arith.constant 0 : i32
    %c0_i32_0 = arith.constant 0 : i32
    %c0_i32_1 = arith.constant 0 : i32
    return %c0_i32, %c0_i32_0 : i32, i32
  }
  func.func @transform_5(%arg0: i32) -> (i32, i32) {
    %c0_i32 = arith.constant 0 : i32
    %c0_i32_0 = arith.constant 0 : i32
    return %arg0, %c0_i32 : i32, i32
  }
}

</mosaic_0001>

<bundles_post_ra>
// kernel: net_forward.1
= control target key start
LH: loop header
LB: loop body
LE: loop exit
PB: predicated region body
PF: predicated region fallthrough
CT: control target
= control target key end

     0   :  { %10 = vsyncpa [#allocation3], 0  ;;  %s3248_s0 = inlined_call_operand.vmem [shape: bf16[16,1792], index: 0, kind: input, shape index: {}]   ;;  %s3249_s1 = inlined_call_operand.hbm [shape: bf16[1792,128], index: 1, kind: input, shape index: {}]   ;;  %s3250_s2 = inlined_call_operand.hbm [shape: bf16[384,256], index: 2, kind: input, shape index: {}]   ;;  %s3251_s3 = inlined_call_operand.vmem [shape: bf16[352,64], index: 3, kind: input, shape index: {}]   ;;  %s3252_s4 = inlined_call_operand.vmem [shape: f32[1,768], index: 4, kind: input, shape index: {}]   ;;  %s3253_s5 = inlined_call_operand.vmem [shape: f32[16,4], index: 5, kind: output, shape index: {}]  }
   0x1   :  { %s18_s20 = sshll.u32 %s3249_s1, 4  ;;  %s19_s20 = int_to_ptr.hbm [resolvable:$true] %s18_s20 }
   0x2   :  { %11 = vsyncpa [#allocation5], 0  ;;  %s2983_s21 = smov [#allocation2]   ;;  %s31_s25 = sshll.u32 %s3250_s2, 4  ;;  %s32_s25 = int_to_ptr.hbm [resolvable:$true] %s31_s25 }
   0x3   :  { %s20_s22 = sshll.u32 %s2983_s21, 4  ;;  %s2984_s26 = smov 64   ;;  %s21_s22 = int_to_ptr.vmem [resolvable:$true] %s20_s22 }
   0x4   :  { %s2985_s27 = smov 4   ;;  %s2986_s28 = smov [#allocation4]  }
   0x5   :  { %26 = dma.hbm_to_vmem [thread:$0]  %s19_s20, 14336, %s21_s22, [#allocation3], %s2984_s26, %s2984_s26, %s2985_s27  }
   0x6   :  { %s33_s29 = sshll.u32 %s2986_s28, 4  ;;  %s2987_s30 = smov 128   ;;  %s34_s29 = int_to_ptr.vmem [resolvable:$true] %s33_s29 }
   0x7   :  { %s2988_s6 = smov 8  }
   0x8   :  { %39 = dma.hbm_to_vmem [thread:$0]  %s32_s25, 6144, %s34_s29, [#allocation5], %s2987_s30, %s2987_s30, %s2988_s6  }
   0x9   :  { %2979 = dma.done.wait [#allocation3], 14336  }
   0xa   :  { %2980 = vsyncadd [#allocation3], 4294952960 }
   0xb   :  { %2981 = dma.done.wait [#allocation5], 6144  }
   0xc   :  { %2982 = vsyncadd [#allocation5], 4294961152  ;;  %v2738_v0 = vld [vmem:[#allocation2 + $0x38] sm:$0xff]  ;;  %v2737_v4 = vld [vmem:[#allocation2 + $0x30] sm:$0xff]  ;;  %vm1828_vm0 = vcmask 523264   ;;  %vm1864_vm1 = vcmask 261120  }
   0xd   :  { %v2746_v1 = vld [vmem:[#allocation2 + $0x78] sm:$0xff]  ;;  %1041 = vmatpush.bf16.msra.mxu0 %v2738_v0  ;;  %v2745_v5 = vld [vmem:[#allocation2 + $0x70] sm:$0xff]  ;;  %v2736_v8 = vld [vmem:[#allocation2 + $0x28] sm:$0xff]  ;;  %vm1920_vm5 = vcmask 31744  }
   0xe   :  { %v2754_v2 = vld [vmem:[#allocation2 + $0xb8] sm:$0xff]  ;;  %1055 = vmatpush.bf16.msra.mxu1 %v2746_v1  ;;  %v2753_v6 = vld [vmem:[#allocation2 + $0xb0] sm:$0xff]  ;;  %v2744_v9 = vld [vmem:[#allocation2 + $0x68] sm:$0xff] }
   0xf   :  { %v2762_v3 = vld [vmem:[#allocation2 + $0xf8] sm:$0xff]  ;;  %1069 = vmatpush.bf16.msra.mxu2 %v2754_v2  ;;  %v2761_v7 = vld [vmem:[#allocation2 + $0xf0] sm:$0xff]  ;;  %v2752_v10 = vld [vmem:[#allocation2 + $0xa8] sm:$0xff] }
  0x10   :  { %1083 = vmatpush.bf16.msra.mxu3 %v2762_v3  ;;  %v2760_v11 = vld [vmem:[#allocation2 + $0xe8] sm:$0xff]  ;;  %v2735_v12 = vld [vmem:[#allocation2 + $0x20] sm:$0xff]  ;;  %v2734_v16 = vld [vmem:[#allocation2 + $0x18] sm:$0xff] }
  0x11   :  { %1042 = vmatpush.bf16.msra.mxu0 %v2737_v4  ;;  %v2743_v13 = vld [vmem:[#allocation2 + $0x60] sm:$0xff]  ;;  %v2742_v17 = vld [vmem:[#allocation2 + $0x58] sm:$0xff]  ;;  %v2733_v20 = vld [vmem:[#allocation2 + $0x10] sm:$0xff] }
  0x12   :  { %1056 = vmatpush.bf16.msra.mxu1 %v2745_v5  ;;  %v2751_v14 = vld [vmem:[#allocation2 + $0xa0] sm:$0xff]  ;;  %v2750_v18 = vld [vmem:[#allocation2 + $0x98] sm:$0xff]  ;;  %v2741_v21 = vld [vmem:[#allocation2 + $0x50] sm:$0xff] }
  0x13   :  { %1070 = vmatpush.bf16.msra.mxu2 %v2753_v6  ;;  %v2759_v15 = vld [vmem:[#allocation2 + $0xe0] sm:$0xff]  ;;  %v2758_v19 = vld [vmem:[#allocation2 + $0xd8] sm:$0xff]  ;;  %v2749_v22 = vld [vmem:[#allocation2 + $0x90] sm:$0xff] }
  0x14   :  { %1084 = vmatpush.bf16.msra.mxu3 %v2761_v7  ;;  %v2757_v23 = vld [vmem:[#allocation2 + $0xd0] sm:$0xff]  ;;  %v2732_v24 = vld [vmem:[#allocation2 + $0x8] sm:$0xff]  ;;  %v2731_v28 = vld [vmem:[#allocation2] sm:$0xff] }
  0x15   :  { %1043 = vmatpush.bf16.msra.mxu0 %v2736_v8  ;;  %v2740_v25 = vld [vmem:[#allocation2 + $0x48] sm:$0xff]  ;;  %v2739_v29 = vld [vmem:[#allocation2 + $0x40] sm:$0xff]  ;;  %v2770_v31 = vld [vmem:[#allocation2 + $0x138] sm:$0xff] }
  0x16   :  { %1057 = vmatpush.bf16.msra.mxu1 %v2744_v9  ;;  %v2748_v26 = vld [vmem:[#allocation2 + $0x88] sm:$0xff]  ;;  %v2747_v30 = vld [vmem:[#allocation2 + $0x80] sm:$0xff]  ;;  %v2724_v33 = vld [vmem:[%s3248_s0 + $0x34] sm:$0xf0] }
  0x17   :  { %1071 = vmatpush.bf16.msra.mxu2 %v2752_v10  ;;  %v2756_v27 = vld [vmem:[#allocation2 + $0xc8] sm:$0xff]  ;;  %v1931_v32 = vld [vmem:[%s3248_s0] sm:$0xf]  ;;  %v2778_v34 = vld [vmem:[#allocation2 + $0x178] sm:$0xff] }
  0x18   :  { %1085 = vmatpush.bf16.msra.mxu3 %v2760_v11  ;;  %v1939_v35 = vld [vmem:[%s3248_s0 + $0x8] sm:$0xf]  ;;  %v2725_v36 = vld [vmem:[%s3248_s0 + $0x3c] sm:$0xf0]  ;;  %v2786_v37 = vld [vmem:[#allocation2 + $0x1b8] sm:$0xff]  ;;  %v3043_v41 = vor.u32 %v2724_v33, %v1931_v32 }
  0x19   :  { %1044 = vmatpush.bf16.msra.mxu0 %v2735_v12  ;;  %v2717_v38 = vld [vmem:[%s3248_s0 + $0x4] sm:$0xf]  ;;  %v1933_v39 = vld [vmem:[%s3248_s0 + $0x38] sm:$0xf0]  ;;  %v1940_v43 = vor.u32 %v2725_v36, %v1939_v35  ;;  %v2718_v44 = vld [vmem:[%s3248_s0 + $0xc] sm:$0xf] }
  0x1a   :  { %1058 = vmatpush.bf16.msra.mxu1 %v2743_v13  ;;  %v2755_v40 = vld [vmem:[#allocation2 + $0xc0] sm:$0xff]  ;;  %v2794_v42 = vld [vmem:[#allocation2 + $0x1f8] sm:$0xff]  ;;  %v2769_v46 = vld [vmem:[#allocation2 + $0x130] sm:$0xff]  ;;  %v3051_v47 = vor.u32 %v2717_v38, %v1933_v39 }
  0x1b   :  { %1072 = vmatpush.bf16.msra.mxu2 %v2751_v14  ;;  %v1941_v45 = vld [vmem:[%s3248_s0 + $0x40] sm:$0xf0]  ;;  %v2777_v48 = vld [vmem:[#allocation2 + $0x170] sm:$0xff]  ;;  %v2768_v52 = vld [vmem:[#allocation2 + $0x128] sm:$0xff] }
  0x1c   :  { %1086 = vmatpush.bf16.msra.mxu3 %v2759_v15  ;;  %v2785_v49 = vld [vmem:[#allocation2 + $0x1b0] sm:$0xff]  ;;  %v1944_v50 = vor.u32 %v2718_v44, %v1941_v45  ;;  %v2776_v53 = vld [vmem:[#allocation2 + $0x168] sm:$0xff]  ;;  %v2767_v56 = vld [vmem:[#allocation2 + $0x120] sm:$0xff] }
  0x1d   :  { %1045 = vmatpush.bf16.msra.mxu0 %v2734_v16  ;;  %v2793_v51 = vld [vmem:[#allocation2 + $0x1f0] sm:$0xff]  ;;  %v2784_v54 = vld [vmem:[#allocation2 + $0x1a8] sm:$0xff]  ;;  %v2775_v57 = vld [vmem:[#allocation2 + $0x160] sm:$0xff] }
  0x1e   :  { %1059 = vmatpush.bf16.msra.mxu1 %v2742_v17  ;;  %v2792_v55 = vld [vmem:[#allocation2 + $0x1e8] sm:$0xff]  ;;  %v2783_v58 = vld [vmem:[#allocation2 + $0x1a0] sm:$0xff]  ;;  %v2766_v60 = vld [vmem:[#allocation2 + $0x118] sm:$0xff] }
  0x1f   :  { %1073 = vmatpush.bf16.msra.mxu2 %v2750_v18  ;;  %v2791_v59 = vld [vmem:[#allocation2 + $0x1e0] sm:$0xff]  ;;  %v2774_v61 = vld [vmem:[#allocation2 + $0x158] sm:$0xff]  ;;  %v2765_v0 = vld [vmem:[#allocation2 + $0x110] sm:$0xff] }
  0x20   :  { %1087 = vmatpush.bf16.msra.mxu3 %v2758_v19  ;;  %v2782_v62 = vld [vmem:[#allocation2 + $0x198] sm:$0xff]  ;;  %v2773_v1 = vld [vmem:[#allocation2 + $0x150] sm:$0xff]  ;;  %v2764_v4 = vld [vmem:[#allocation2 + $0x108] sm:$0xff] }
  0x21   :  { %1046 = vmatpush.bf16.msra.mxu0 %v2733_v20  ;;  %v2790_v63 = vld [vmem:[#allocation2 + $0x1d8] sm:$0xff]  ;;  %v2781_v2 = vld [vmem:[#allocation2 + $0x190] sm:$0xff]  ;;  %v2772_v5 = vld [vmem:[#allocation2 + $0x148] sm:$0xff] }
  0x22   :  { %1060 = vmatpush.bf16.msra.mxu1 %v2741_v21  ;;  %v2789_v3 = vld [vmem:[#allocation2 + $0x1d0] sm:$0xff]  ;;  %v2780_v6 = vld [vmem:[#allocation2 + $0x188] sm:$0xff]  ;;  %v2763_v8 = vld [vmem:[#allocation2 + $0x100] sm:$0xff] }
  0x23   :  { %1074 = vmatpush.bf16.msra.mxu2 %v2749_v22  ;;  %v2788_v7 = vld [vmem:[#allocation2 + $0x1c8] sm:$0xff]  ;;  %v2771_v9 = vld [vmem:[#allocation2 + $0x140] sm:$0xff]  ;;  %v2802_v11 = vld [vmem:[#allocation2 + $0x238] sm:$0xff] }
  0x24   :  { %1088 = vmatpush.bf16.msra.mxu3 %v2757_v23  ;;  %v2779_v10 = vld [vmem:[#allocation2 + $0x180] sm:$0xff]  ;;  %v2810_v12 = vld [vmem:[#allocation2 + $0x278] sm:$0xff]  ;;  %v1947_v13 = vld [vmem:[%s3248_s0 + $0x10] sm:$0xf] }
  0x25   :  { %1047 = vmatpush.bf16.msra.mxu0 %v2732_v24  ;;  %v2726_v14 = vld [vmem:[%s3248_s0 + $0x44] sm:$0xf0]  ;;  %v1955_v15 = vld [vmem:[%s3248_s0 + $0x18] sm:$0xf]  ;;  %v2727_v16 = vld [vmem:[%s3248_s0 + $0x4c] sm:$0xf0] }
  0x26   :  { %1061 = vmatpush.bf16.msra.mxu1 %v2740_v25  ;;  %v2818_v17 = vld [vmem:[#allocation2 + $0x2b8] sm:$0xff]  ;;  %v2719_v18 = vld [vmem:[%s3248_s0 + $0x14] sm:$0xf]  ;;  %v1949_v19 = vld [vmem:[%s3248_s0 + $0x48] sm:$0xf0]  ;;  %v1948_v23 = vor.u32 %v2726_v14, %v1947_v13  ;;  %v1956_v24 = vor.u32 %v2727_v16, %v1955_v15 }
  0x27   :  { %1075 = vmatpush.bf16.msra.mxu2 %v2748_v26  ;;  %v2787_v20 = vld [vmem:[#allocation2 + $0x1c0] sm:$0xff]  ;;  %v2720_v21 = vld [vmem:[%s3248_s0 + $0x1c] sm:$0xf]  ;;  %v1957_v22 = vld [vmem:[%s3248_s0 + $0x50] sm:$0xf0]  ;;  %v1952_v26 = vor.u32 %v2719_v18, %v1949_v19 }
  0x28   :  { %1089 = vmatpush.bf16.msra.mxu3 %v2756_v27  ;;  %v2826_v25 = vld [vmem:[#allocation2 + $0x2f8] sm:$0xff]  ;;  %v1960_v27 = vor.u32 %v2720_v21, %v1957_v22  ;;  %v2800_v32 = vld [vmem:[#allocation2 + $0x228] sm:$0xff]  ;;  %v2799_v36 = vld [vmem:[#allocation2 + $0x220] sm:$0xff] }
  0x29   :  { %1048 = vmatpush.bf16.msra.mxu0 %v2731_v28  ;;  %v2801_v28 = vld [vmem:[#allocation2 + $0x230] sm:$0xff]  ;;  %v2808_v33 = vld [vmem:[#allocation2 + $0x268] sm:$0xff]  ;;  %v2815_v38 = vld [vmem:[#allocation2 + $0x2a0] sm:$0xff] }
  0x2a   :  { %1062 = vmatpush.bf16.msra.mxu1 %v2739_v29  ;;  %v2809_v29 = vld [vmem:[#allocation2 + $0x270] sm:$0xff]  ;;  %v2824_v35 = vld [vmem:[#allocation2 + $0x2e8] sm:$0xff]  ;;  %v2823_v39 = vld [vmem:[#allocation2 + $0x2e0] sm:$0xff] }
  0x2b   :  { %1076 = vmatpush.bf16.msra.mxu2 %v2747_v30  ;;  %v2817_v30 = vld [vmem:[#allocation2 + $0x2b0] sm:$0xff]  ;;  %v2822_v44 = vld [vmem:[#allocation2 + $0x2d8] sm:$0xff]  ;;  %v2839_v13 = vld [vmem:[#allocation2 + $0x360] sm:$0xff] }
  0x2c   :  { %1090 = vmatpush.bf16.msra.mxu3 %v2755_v40  ;;  %1049 = vmatmul.bf16.vlgmr.msra.gmra.mxu0 %v3043_v41  ;;  %v2798_v40 = vld [vmem:[#allocation2 + $0x218] sm:$0xff]  ;;  %v2797_v45 = vld [vmem:[#allocation2 + $0x210] sm:$0xff]  ;;  %v2828_v18 = vld [vmem:[#allocation2 + $0x308] sm:$0xff] }
  0x2d   :  { %1097 = vmatpush.bf16.msrb.mxu0 %v2770_v31  ;;  %1063 = vmatmul.bf16.vlgmr.msra.gmra.mxu1 %v3051_v47  ;;  %v2825_v31 = vld [vmem:[#allocation2 + $0x2f0] sm:$0xff]  ;;  %v2830_v14 = vld [vmem:[#allocation2 + $0x318] sm:$0xff]  ;;  %v2836_v19 = vld [vmem:[#allocation2 + $0x348] sm:$0xff] }
  0x2e   :  { %1111 = vmatpush.bf16.msrb.mxu1 %v2778_v34  ;;  %1077 = vmatmul.bf16.vlgmr.msra.gmra.mxu2 %v1940_v43  ;;  %v2816_v34 = vld [vmem:[#allocation2 + $0x2a8] sm:$0xff]  ;;  %v2814_v43 = vld [vmem:[#allocation2 + $0x298] sm:$0xff]  ;;  %v2829_v16 = vld [vmem:[#allocation2 + $0x310] sm:$0xff] }
  0x2f   :  { %1125 = vmatpush.bf16.msrb.mxu2 %v2786_v37  ;;  %1091 = vmatmul.bf16.vlgmr.msra.gmra.mxu3 %v1944_v50  ;;  %v2807_v37 = vld [vmem:[#allocation2 + $0x260] sm:$0xff]  ;;  %v2796_v50 = vld [vmem:[#allocation2 + $0x208] sm:$0xff]  ;;  %v2838_v15 = vld [vmem:[#allocation2 + $0x358] sm:$0xff] }
  0x30   :  { %1139 = vmatpush.bf16.msrb.mxu3 %v2794_v42  ;;  %v2806_v42 = vld [vmem:[#allocation2 + $0x258] sm:$0xff]  ;;  %v1979_v21 = vld [vmem:[%s3248_s0 + $0x30] sm:$0xf]  ;;  %v2730_v22 = vld [vmem:[%s3248_s0 + $0x64] sm:$0xf0] }
  0x31   :  { %1098 = vmatpush.bf16.msrb.mxu0 %v2769_v46  ;;  %v2805_v46 = vld [vmem:[#allocation2 + $0x250] sm:$0xff] }
  0x32   :  { %1112 = vmatpush.bf16.msrb.mxu1 %v2777_v48  ;;  %v2813_v48 = vld [vmem:[#allocation2 + $0x290] sm:$0xff] }
  0x33   :  { %1126 = vmatpush.bf16.msrb.mxu2 %v2785_v49  ;;  %v2821_v49 = vld [vmem:[#allocation2 + $0x2d0] sm:$0xff] }
  0x34   :  { %1140 = vmatpush.bf16.msrb.mxu3 %v2793_v51  ;;  %v2804_v51 = vld [vmem:[#allocation2 + $0x248] sm:$0xff] }
  0x35   :  { %1099 = vmatpush.bf16.msrb.mxu0 %v2768_v52  ;;  %v2812_v52 = vld [vmem:[#allocation2 + $0x288] sm:$0xff] }
  0x36   :  { %1113 = vmatpush.bf16.msrb.mxu1 %v2776_v53  ;;  %v2820_v53 = vld [vmem:[#allocation2 + $0x2c8] sm:$0xff] }
  0x37   :  { %1127 = vmatpush.bf16.msrb.mxu2 %v2784_v54  ;;  %v2795_v54 = vld [vmem:[#allocation2 + $0x200] sm:$0xff] }
  0x38   :  { %1141 = vmatpush.bf16.msrb.mxu3 %v2792_v55  ;;  %v2803_v55 = vld [vmem:[#allocation2 + $0x240] sm:$0xff] }
  0x39   :  { %1100 = vmatpush.bf16.msrb.mxu0 %v2767_v56  ;;  %v2811_v56 = vld [vmem:[#allocation2 + $0x280] sm:$0xff] }
  0x3a   :  { %1114 = vmatpush.bf16.msrb.mxu1 %v2775_v57  ;;  %v1963_v57 = vld [vmem:[%s3248_s0 + $0x20] sm:$0xf] }
  0x3b   :  { %1128 = vmatpush.bf16.msrb.mxu2 %v2783_v58  ;;  %v2728_v58 = vld [vmem:[%s3248_s0 + $0x54] sm:$0xf0] }
  0x3c   :  { %1142 = vmatpush.bf16.msrb.mxu3 %v2791_v59  ;;  %v1971_v59 = vld [vmem:[%s3248_s0 + $0x28] sm:$0xf] }
  0x3d   :  { %1101 = vmatpush.bf16.msrb.mxu0 %v2766_v60  ;;  %v2729_v60 = vld [vmem:[%s3248_s0 + $0x5c] sm:$0xf0] }
  0x3e   :  { %1115 = vmatpush.bf16.msrb.mxu1 %v2774_v61  ;;  %v2721_v61 = vld [vmem:[%s3248_s0 + $0x24] sm:$0xf] }
  0x3f   :  { %1129 = vmatpush.bf16.msrb.mxu2 %v2782_v62  ;;  %v1965_v62 = vld [vmem:[%s3248_s0 + $0x58] sm:$0xf0] }
  0x40   :  { %1143 = vmatpush.bf16.msrb.mxu3 %v2790_v63  ;;  %v2834_v63 = vld [vmem:[#allocation2 + $0x338] sm:$0xff] }
  0x41   :  { %1102 = vmatpush.bf16.msrb.mxu0 %v2765_v0  ;;  %v2842_v0 = vld [vmem:[#allocation2 + $0x378] sm:$0xff] }
  0x42   :  { %1116 = vmatpush.bf16.msrb.mxu1 %v2773_v1  ;;  %v2819_v1 = vld [vmem:[#allocation2 + $0x2c0] sm:$0xff] }
  0x43   :  { %1130 = vmatpush.bf16.msrb.mxu2 %v2781_v2  ;;  %v1964_v2 = vor.u32 %v2728_v58, %v1963_v57 }
  0x44   :  { %1144 = vmatpush.bf16.msrb.mxu3 %v2789_v3  ;;  %v2722_v3 = vld [vmem:[%s3248_s0 + $0x2c] sm:$0xf] }
  0x45   :  { %1103 = vmatpush.bf16.msrb.mxu0 %v2764_v4  ;;  %v1973_v4 = vld [vmem:[%s3248_s0 + $0x60] sm:$0xf0] }
  0x46   :  { %1117 = vmatpush.bf16.msrb.mxu1 %v2772_v5  ;;  %v1972_v5 = vor.u32 %v2729_v60, %v1971_v59  ;;  %v2459_v59 = vld [vmem:[#allocation4 + $0x130] sm:$0xf]  ;;  %v2882_v60 = vld [vmem:[#allocation4 + $0x134] sm:$0xf0] }
  0x47   :  { %1131 = vmatpush.bf16.msrb.mxu2 %v2780_v6  ;;  %v1968_v6 = vor.u32 %v2721_v61, %v1965_v62  ;;  %v2881_v61 = vld [vmem:[#allocation4 + $0x134] sm:$0xf]  ;;  %v3126_v62 = vld [vmem:[%s3252_s4] ss:$0 sm:$0xff] }
  0x48   :  { %1145 = vmatpush.bf16.msrb.mxu3 %v2788_v7  ;;  %v1976_v7 = vor.u32 %v2722_v3, %v1973_v4  ;;  %v2858_v3 = vld [vmem:[#allocation4 + $0x74] sm:$0xf0] }
  0x49   :  { %1104 = vmatpush.bf16.msrb.mxu0 %v2763_v8  ;;  %v2833_v8 = vld [vmem:[#allocation2 + $0x330] sm:$0xff] }
  0x4a   :  { %1118 = vmatpush.bf16.msrb.mxu1 %v2771_v9  ;;  %v2841_v9 = vld [vmem:[#allocation2 + $0x370] sm:$0xff] }
  0x4b   :  { %1132 = vmatpush.bf16.msrb.mxu2 %v2779_v10  ;;  %v2832_v10 = vld [vmem:[#allocation2 + $0x328] sm:$0xff] }
  0x4c   :  { %1146 = vmatpush.bf16.msrb.mxu3 %v2787_v20  ;;  %1105 = vmatmul.bf16.vlgmr.msrb.gmra.mxu0 %v1948_v23  ;;  %v2827_v20 = vld [vmem:[#allocation2 + $0x300] sm:$0xff] }
  0x4d   :  { %1153 = vmatpush.bf16.msra.mxu0 %v2802_v11  ;;  %1119 = vmatmul.bf16.vlgmr.msrb.gmra.mxu1 %v1952_v26  ;;  %v2840_v11 = vld [vmem:[#allocation2 + $0x368] sm:$0xff]  ;;  %v2835_v23 = vld [vmem:[#allocation2 + $0x340] sm:$0xff]  ;;  %v1980_v26 = vor.u32 %v2730_v22, %v1979_v21  ;;  %v2445_v21 = vld [vmem:[#allocation4 + $0x118] sm:$0xf0] }
  0x4e   :  { %1167 = vmatpush.bf16.msra.mxu1 %v2810_v12  ;;  %1133 = vmatmul.bf16.vlgmr.msrb.gmra.mxu2 %v1956_v24  ;;  %v2831_v12 = vld [vmem:[#allocation2 + $0x320] sm:$0xff]  ;;  %v2723_v24 = vld [vmem:[%s3248_s0 + $0x34] sm:$0xf] }
  0x4f   :  { %1181 = vmatpush.bf16.msra.mxu2 %v2818_v17  ;;  %1147 = vmatmul.bf16.vlgmr.msrb.gmra.mxu3 %v1960_v27  ;;  %v2837_v17 = vld [vmem:[#allocation2 + $0x350] sm:$0xff]  ;;  %v2611_v22 = vld [vmem:[#allocation4 + $0xe0] sm:$0xf] }
  0x50   :  { %1195 = vmatpush.bf16.msra.mxu3 %v2826_v25  ;;  %v1981_v25 = vld [vmem:[%s3248_s0 + $0x68] sm:$0xf0] }
  0x51   :  { %1154 = vmatpush.bf16.msra.mxu0 %v2801_v28  ;;  %v1984_v27 = vor.u32 %v2723_v24, %v1981_v25  ;;  %v2491_v28 = vld [vmem:[#allocation4 + $0x170] sm:$0xf] }
  0x52   :  { %1168 = vmatpush.bf16.msra.mxu1 %v2809_v29  ;;  %v2890_v29 = vld [vmem:[#allocation4 + $0x174] sm:$0xf0] }
  0x53   :  { %1182 = vmatpush.bf16.msra.mxu2 %v2817_v30  ;;  %v2889_v30 = vld [vmem:[#allocation4 + $0x174] sm:$0xf] }
  0x54   :  { %1196 = vmatpush.bf16.msra.mxu3 %v2825_v31  ;;  %v2492_v31 = vor.u32 %v2890_v29, %v2491_v28 }
  0x55   :  { %1155 = vmatpush.bf16.msra.mxu0 %v2800_v32  ;;  %v2493_v32 = vld [vmem:[#allocation4 + $0x178] sm:$0xf0] }
  0x56   :  { %1169 = vmatpush.bf16.msra.mxu1 %v2808_v33  ;;  %v2496_v33 = vor.u32 %v2889_v30, %v2493_v32 }
  0x57   :  { %1183 = vmatpush.bf16.msra.mxu2 %v2816_v34  ;;  %v2483_v34 = vld [vmem:[#allocation4 + $0x160] sm:$0xf] }
  0x58   :  { %1197 = vmatpush.bf16.msra.mxu3 %v2824_v35  ;;  %v2888_v35 = vld [vmem:[#allocation4 + $0x164] sm:$0xf0] }
  0x59   :  { %1156 = vmatpush.bf16.msra.mxu0 %v2799_v36  ;;  %v2887_v36 = vld [vmem:[#allocation4 + $0x164] sm:$0xf] }
  0x5a   :  { %1170 = vmatpush.bf16.msra.mxu1 %v2807_v37 }
  0x5b   :  { %1184 = vmatpush.bf16.msra.mxu2 %v2815_v38  ;;  %v2484_v38 = vor.u32 %v2888_v35, %v2483_v34  ;;  %v2854_v34 = vld [vmem:[#allocation4 + $0x54] sm:$0xf0] }
  0x5c   :  { %1198 = vmatpush.bf16.msra.mxu3 %v2823_v39  ;;  %v2485_v39 = vld [vmem:[#allocation4 + $0x168] sm:$0xf0] }
  0x5d   :  { %1157 = vmatpush.bf16.msra.mxu0 %v2798_v40 }
  0x5e   :  { %1171 = vmatpush.bf16.msra.mxu1 %v2806_v42  ;;  %v2488_v42 = vor.u32 %v2887_v36, %v2485_v39  ;;  %v2435_v36 = vld [vmem:[#allocation4 + $0x100] sm:$0xf] }
  0x5f   :  { %1185 = vmatpush.bf16.msra.mxu2 %v2814_v43  ;;  %v2475_v43 = vld [vmem:[#allocation4 + $0x150] sm:$0xf] }
  0x60   :  { %1199 = vmatpush.bf16.msra.mxu3 %v2822_v44  ;;  %v2886_v44 = vld [vmem:[#allocation4 + $0x154] sm:$0xf0] }
  0x61   :  { %1158 = vmatpush.bf16.msra.mxu0 %v2797_v45  ;;  %v2885_v45 = vld [vmem:[#allocation4 + $0x154] sm:$0xf] }
  0x62   :  { %1172 = vmatpush.bf16.msra.mxu1 %v2805_v46  ;;  %v2476_v46 = vor.u32 %v2886_v44, %v2475_v43  ;;  %v2603_v43 = vld [vmem:[#allocation4 + $0xd0] sm:$0xf]  ;;  %v2870_v44 = vld [vmem:[#allocation4 + $0xd4] sm:$0xf0] }
  0x63   :  { %1186 = vmatpush.bf16.msra.mxu2 %v2813_v48  ;;  %v2477_v48 = vld [vmem:[#allocation4 + $0x158] sm:$0xf0] }
  0x64   :  { %1200 = vmatpush.bf16.msra.mxu3 %v2821_v49  ;;  %v2480_v49 = vor.u32 %v2885_v45, %v2477_v48  ;;  %v2857_v48 = vld [vmem:[#allocation4 + $0x74] sm:$0xf] }
  0x65   :  { %1159 = vmatpush.bf16.msra.mxu0 %v2796_v50  ;;  %v2467_v50 = vld [vmem:[#allocation4 + $0x140] sm:$0xf] }
  0x66   :  { %1173 = vmatpush.bf16.msra.mxu1 %v2804_v51  ;;  %v2884_v51 = vld [vmem:[#allocation4 + $0x144] sm:$0xf0] }
  0x67   :  { %1187 = vmatpush.bf16.msra.mxu2 %v2812_v52  ;;  %v2883_v52 = vld [vmem:[#allocation4 + $0x144] sm:$0xf] }
  0x68   :  { %1201 = vmatpush.bf16.msra.mxu3 %v2820_v53 }
  0x69   :  { %1160 = vmatpush.bf16.msra.mxu0 %v2795_v54  ;;  %v2468_v54 = vor.u32 %v2884_v51, %v2467_v50 }
  0x6a   :  { %1174 = vmatpush.bf16.msra.mxu1 %v2803_v55  ;;  %v2469_v55 = vld [vmem:[#allocation4 + $0x148] sm:$0xf0] }
  0x6b   :  { %1188 = vmatpush.bf16.msra.mxu2 %v2811_v56  ;;  %v2472_v56 = vor.u32 %v2883_v52, %v2469_v55  ;;  %v2621_v52 = vld [vmem:[#allocation4 + $0xf8] sm:$0xf0]  ;;  %v2852_v55 = vld [vmem:[#allocation4 + $0x44] sm:$0xf0] }
  0x6c   :  { %1202 = vmatpush.bf16.msra.mxu3 %v2819_v1  ;;  %1161 = vmatmul.bf16.vlgmr.msra.gmra.mxu0 %v1964_v2  ;;  %v2461_v1 = vld [vmem:[#allocation4 + $0x138] sm:$0xf0]  ;;  %v2555_v2 = vld [vmem:[#allocation4 + $0x70] sm:$0xf] }
  0x6d   :  { %1209 = vmatpush.bf16.msrb.mxu0 %v2834_v63  ;;  %1175 = vmatmul.bf16.vlgmr.msra.gmra.mxu1 %v1968_v6  ;;  %v2464_v4 = vor.u32 %v2881_v61, %v2461_v1  ;;  %v2451_v6 = vld [vmem:[#allocation4 + $0x120] sm:$0xf]  ;;  %v2868_v1 = vld [vmem:[#allocation4 + $0xc4] sm:$0xf0] }
  0x6e   :  { %1223 = vmatpush.bf16.msrb.mxu1 %v2842_v0  ;;  %1189 = vmatmul.bf16.vlgmr.msra.gmra.mxu2 %v1972_v5  ;;  %v2460_v0 = vor.u32 %v2882_v60, %v2459_v59  ;;  %v2556_v5 = vor.u32 %v2858_v3, %v2555_v2  ;;  %v2855_v2 = vld [vmem:[#allocation4 + $0x64] sm:$0xf]  ;;  %v2549_v3 = vld [vmem:[#allocation4 + $0x68] sm:$0xf0] }
  0x6f   :  { %1203 = vmatmul.bf16.vlgmr.msra.gmra.mxu3 %v1976_v7  ;;  %1368 = vmatpush.bf16.msrb.mxu2 %v2492_v31  ;;  %v2880_v7 = vld [vmem:[#allocation4 + $0x124] sm:$0xf0] }
  0x70   :  { %1382 = vmatpush.bf16.msrb.mxu3 %v2496_v33  ;;  %v2539_v33 = vld [vmem:[#allocation4 + $0x50] sm:$0xf] }
  0x71   :  { %1210 = vmatpush.bf16.msrb.mxu0 %v2833_v8  ;;  %v2879_v8 = vld [vmem:[#allocation4 + $0x124] sm:$0xf]  ;;  %v2540_v35 = vor.u32 %v2854_v34, %v2539_v33  ;;  %v2533_v34 = vld [vmem:[#allocation4 + $0x48] sm:$0xf0] }
  0x72   :  { %1224 = vmatpush.bf16.msrb.mxu1 %v2841_v9  ;;  %v2452_v9 = vor.u32 %v2880_v7, %v2451_v6  ;;  %v2552_v7 = vor.u32 %v2855_v2, %v2549_v3  ;;  %v2847_v3 = vld [vmem:[#allocation4 + $0x24] sm:$0xf] }
  0x73   :  { %1369 = vmatpush.bf16.msrb.mxu2 %v2484_v38  ;;  %v2875_v38 = vld [vmem:[#allocation4 + $0x104] sm:$0xf] }
  0x74   :  { %1383 = vmatpush.bf16.msrb.mxu3 %v2488_v42  ;;  %v2437_v42 = vld [vmem:[#allocation4 + $0x108] sm:$0xf0] }
  0x75   :  { %1211 = vmatpush.bf16.msrb.mxu0 %v2832_v10  ;;  %v2453_v10 = vld [vmem:[#allocation4 + $0x128] sm:$0xf0]  ;;  %v2440_v45 = vor.u32 %v2875_v38, %v2437_v42 }
  0x76   :  { %1225 = vmatpush.bf16.msrb.mxu1 %v2840_v11  ;;  %v2619_v11 = vld [vmem:[#allocation4 + $0xf0] sm:$0xf] }
  0x77   :  { %1370 = vmatpush.bf16.msrb.mxu2 %v2476_v46  ;;  %v2604_v46 = vor.u32 %v2870_v44, %v2603_v43  ;;  %v2507_v43 = vld [vmem:[#allocation4 + $0x10] sm:$0xf] }
  0x78   :  { %1384 = vmatpush.bf16.msrb.mxu3 %v2480_v49  ;;  %v2557_v49 = vld [vmem:[#allocation4 + $0x78] sm:$0xf0] }
  0x79   :  { %1212 = vmatpush.bf16.msrb.mxu0 %v2831_v12  ;;  %v2874_v12 = vld [vmem:[#allocation4 + $0xf4] sm:$0xf0]  ;;  %v2560_v51 = vor.u32 %v2857_v48, %v2557_v49  ;;  %v2571_v48 = vld [vmem:[#allocation4 + $0x90] sm:$0xf] }
  0x7a   :  { %1226 = vmatpush.bf16.msrb.mxu1 %v2839_v13  ;;  %v2456_v13 = vor.u32 %v2879_v8, %v2453_v10  ;;  %v2862_v49 = vld [vmem:[#allocation4 + $0x94] sm:$0xf0] }
  0x7b   :  { %1371 = vmatpush.bf16.msrb.mxu2 %v2468_v54  ;;  %v2531_v54 = vld [vmem:[#allocation4 + $0x40] sm:$0xf] }
  0x7c   :  { %1385 = vmatpush.bf16.msrb.mxu3 %v2472_v56  ;;  %v2532_v60 = vor.u32 %v2852_v55, %v2531_v54  ;;  %v2865_v54 = vld [vmem:[#allocation4 + $0xb4] sm:$0xf]  ;;  %v2589_v55 = vld [vmem:[#allocation4 + $0xb8] sm:$0xf0] }
  0x7d   :  { %1213 = vmatpush.bf16.msrb.mxu0 %v2830_v14  ;;  %v2620_v14 = vor.u32 %v2874_v12, %v2619_v11 }
  0x7e   :  { %1227 = vmatpush.bf16.msrb.mxu1 %v2838_v15  ;;  %v2547_v15 = vld [vmem:[#allocation4 + $0x60] sm:$0xf] }
  0x7f   :  { %1372 = vmatpush.bf16.msrb.mxu2 %v2460_v0  ;;  %v2595_v0 = vld [vmem:[#allocation4 + $0xc0] sm:$0xf] }
  0x80   :  { %1386 = vmatpush.bf16.msrb.mxu3 %v2464_v4  ;;  %v2871_v4 = vld [vmem:[#allocation4 + $0xe4] sm:$0xf] }
  0x81   :  { %1214 = vmatpush.bf16.msrb.mxu0 %v2829_v16  ;;  %v2856_v16 = vld [vmem:[#allocation4 + $0x64] sm:$0xf0] }
  0x82   :  { %1228 = vmatpush.bf16.msrb.mxu1 %v2837_v17  ;;  %v2443_v17 = vld [vmem:[#allocation4 + $0x110] sm:$0xf] }
  0x83   :  { %1373 = vmatpush.bf16.msrb.mxu2 %v2452_v9 }
  0x84   :  { %1387 = vmatpush.bf16.msrb.mxu3 %v2456_v13 }
  0x85   :  { %1215 = vmatpush.bf16.msrb.mxu0 %v2828_v18  ;;  %v2548_v18 = vor.u32 %v2856_v16, %v2547_v15  ;;  %v2866_v15 = vld [vmem:[#allocation4 + $0xb4] sm:$0xf0]  ;;  %v2853_v16 = vld [vmem:[#allocation4 + $0x54] sm:$0xf] }
  0x86   :  { %1229 = vmatpush.bf16.msrb.mxu1 %v2836_v19  ;;  %v2878_v19 = vld [vmem:[#allocation4 + $0x114] sm:$0xf0] }
  0x89   :  { %1216 = vmatpush.bf16.msrb.mxu0 %v2827_v20  ;;  %v2877_v20 = vld [vmem:[#allocation4 + $0x114] sm:$0xf] }
  0x8a   :  { %1230 = vmatpush.bf16.msrb.mxu1 %v2835_v23  ;;  %v2872_v23 = vld [vmem:[#allocation4 + $0xe4] sm:$0xf0]  ;;  %v2448_v28 = vor.u32 %v2877_v20, %v2445_v21  ;;  %v2605_v20 = vld [vmem:[#allocation4 + $0xd8] sm:$0xf0] }
  0x8c   :  { %1217 = vmatmul.bf16.vlgmr.msrb.gmra.mxu0 %v1980_v26  ;;  %v2444_v26 = vor.u32 %v2878_v19, %v2443_v17  ;;  %1388 = vmatpush.bf16.msrb.mxu3 %v2448_v28  ;;  %v2869_v19 = vld [vmem:[#allocation4 + $0xd4] sm:$0xf]  ;;  %v2864_v28 = vld [vmem:[#allocation4 + $0xa4] sm:$0xf0] }
  0x8d   :  { %1231 = vmatmul.bf16.vlgmr.msrb.gmra.mxu1 %v1984_v27  ;;  %1556 = vmatpush.bf16.msra.mxu0 %v2556_v5  ;;  %v2612_v27 = vor.u32 %v2872_v23, %v2611_v22  ;;  %v2613_v5 = vld [vmem:[#allocation4 + $0xe8] sm:$0xf0]  ;;  %v2515_v22 = vld [vmem:[#allocation4 + $0x20] sm:$0xf] }
  0x8e   :  { %1570 = vmatpush.bf16.msra.mxu1 %v2620_v14  ;;  %1374 = vmatpush.bf16.msrb.mxu2 %v2444_v26  ;;  %v2616_v8 = vor.u32 %v2871_v4, %v2613_v5  ;;  %v2587_v14 = vld [vmem:[#allocation4 + $0xb0] sm:$0xf]  ;;  %v2517_v4 = vld [vmem:[#allocation4 + $0x28] sm:$0xf0] }
  0x8f   :  { %v2588_v17 = vor.u32 %v2866_v15, %v2587_v14  ;;  %v2861_v14 = vld [vmem:[#allocation4 + $0x94] sm:$0xf] }
  0x90   :  { %1389 = vmatpush.bf16.msrb.mxu3 %v2440_v45 }
  0x91   :  { %1557 = vmatpush.bf16.msra.mxu0 %v2548_v18  ;;  %v2541_v18 = vld [vmem:[#allocation4 + $0x58] sm:$0xf0] }
  0x92   :  { %1571 = vmatpush.bf16.msra.mxu1 %v2612_v27  ;;  %v2544_v21 = vor.u32 %v2853_v16, %v2541_v18  ;;  %v2579_v27 = vld [vmem:[#allocation4 + $0xa0] sm:$0xf] }
  0x93   :  { %v2580_v33 = vor.u32 %v2864_v28, %v2579_v27 }
  0x95   :  { %1558 = vmatpush.bf16.msra.mxu0 %v2540_v35  ;;  %v2867_v35 = vld [vmem:[#allocation4 + $0xc4] sm:$0xf] }
  0x96   :  { %1572 = vmatpush.bf16.msra.mxu1 %v2604_v46 }
  0x99   :  { %1559 = vmatpush.bf16.msra.mxu0 %v2532_v60  ;;  %v2592_v60 = vor.u32 %v2865_v54, %v2589_v55  ;;  %v2895_v54 = vld [vmem:[%s3251_s3 + $0x20] sm:$0xff]  ;;  %v2894_v55 = vld [vmem:[%s3251_s3 + $0x18] sm:$0xff] }
  0xa9   :  { %v1050_v37 = vpop.f32.mrf.mxu0 }
  0xaa   :  { %v3115_v40 = vpop.f32.mrf.mxu1  ;;  %v1051_v24 = vadd.f32 %v3126_v62, %v1050_v37  ;;  %v2876_v37 = vld [vmem:[#allocation4 + $0x104] sm:$0xf0] }
  0xab   :  { %v2436_v39 = vor.u32 %v2876_v37, %v2435_v36  ;;  %v2597_v36 = vld [vmem:[#allocation4 + $0xc8] sm:$0xf0] }
  0xac   :  { %v1065_v31 = vadd.f32 %v3115_v40, %v1051_v24  ;;  %v2873_v40 = vld [vmem:[#allocation4 + $0xf4] sm:$0xf]  ;;  %v2600_v42 = vor.u32 %v2867_v35, %v2597_v36 }
  0xad   :  { %1375 = vmatpush.bf16.msrb.mxu2 %v2436_v39  ;;  %v2624_v59 = vor.u32 %v2873_v40, %v2621_v52  ;;  %v2849_v40 = vld [vmem:[#allocation4 + $0x34] sm:$0xf]  ;;  %v2525_v52 = vld [vmem:[#allocation4 + $0x38] sm:$0xf0] }
  0xaf   :  { %1598 = vmatpush.bf16.msra.mxu3 %v2624_v59  ;;  %v2528_v59 = vor.u32 %v2849_v40, %v2525_v52 }
  0xb1   :  { %v3117_v53 = vpop.f32.mrf.mxu2  ;;  %v3119_v57 = vpop.f32.mrf.mxu0  ;;  %1584 = vmatpush.bf16.msra.mxu2 %v2560_v51  ;;  %v2572_v51 = vor.u32 %v2862_v49, %v2571_v48 }
  0xb2   :  { %v3121_v58 = vpop.f32.mrf.mxu1  ;;  %v3128_v63 = vpop.f32.mrf.mxu3  ;;  %v1079_v50 = vadd.f32 %v3117_v53, %v1065_v31  ;;  %v1053_v56 = vadd.f32 %v3126_v62, %v3119_v57  ;;  %v2596_v53 = vor.u32 %v2868_v1, %v2595_v0  ;;  %v2523_v57 = vld [vmem:[#allocation4 + $0x30] sm:$0xf]  ;;  %v2850_v62 = vld [vmem:[#allocation4 + $0x34] sm:$0xf0]  ;;  %v2851_v31 = vld [vmem:[#allocation4 + $0x44] sm:$0xf] }
  0xb3   :  { %v2524_v12 = vor.u32 %v2850_v62, %v2523_v57  ;;  %1599 = vmatpush.bf16.msra.mxu3 %v2616_v8  ;;  %v2536_v39 = vor.u32 %v2851_v31, %v2533_v34  ;;  %v2844_v0 = vld [vmem:[#allocation4 + $0x4] sm:$0xf0]  ;;  %v2581_v8 = vld [vmem:[#allocation4 + $0xa8] sm:$0xf0] }
  0xb4   :  { %v1093_v9 = vadd.f32 %v3128_v63, %v1079_v50  ;;  %v1067_v10 = vadd.f32 %v3121_v58, %v1053_v56  ;;  %1573 = vmatpush.bf16.msra.mxu1 %v2596_v53  ;;  %v2608_v63 = vor.u32 %v2869_v19, %v2605_v20  ;;  %v2848_v58 = vld [vmem:[#allocation4 + $0x24] sm:$0xf0] }
  0xb5   :  { %1585 = vmatpush.bf16.msra.mxu2 %v2552_v7  ;;  %1560 = vmatpush.bf16.msra.mxu0 %v2524_v12  ;;  %v2516_v26 = vor.u32 %v2848_v58, %v2515_v22  ;;  %v2860_v53 = vld [vmem:[#allocation4 + $0x84] sm:$0xf0]  ;;  %v2863_v7 = vld [vmem:[#allocation4 + $0xa4] sm:$0xf] }
  0xb6   :  { %v2584_v62 = vor.u32 %v2863_v7, %v2581_v8  ;;  %v2859_v58 = vld [vmem:[#allocation4 + $0x84] sm:$0xf]  ;;  %v68_v8 = vld [vmem:[%s3252_s4 + $0x1] sm:$0x3] }
  0xb7   :  { %1600 = vmatpush.bf16.msra.mxu3 %v2608_v63  ;;  %v2501_v63 = vld [vmem:[#allocation4 + $0x8] sm:$0xf0] }
  0xb8   :  { %1574 = vmatpush.bf16.msra.mxu1 %v2588_v17 }
  0xb9   :  { %v3131_v25 = vpop.f32.mrf.mxu2  ;;  %1586 = vmatpush.bf16.msra.mxu2 %v2544_v21  ;;  %1561 = vmatpush.bf16.msra.mxu0 %v2516_v26  ;;  %v2843_v21 = vld [vmem:[#allocation4 + $0x4] sm:$0xf] }
  0xba   :  { %v3138_v32 = vpop.f32.mrf.mxu3  ;;  %v1081_v23 = vadd.f32 %v3131_v25, %v1067_v10  ;;  %v2846_v25 = vld [vmem:[#allocation4 + $0x14] sm:$0xf0]  ;;  %v2509_v10 = vld [vmem:[#allocation4 + $0x18] sm:$0xf0] }
  0xbb   :  { %v2508_v46 = vor.u32 %v2846_v25, %v2507_v43  ;;  %1601 = vmatpush.bf16.msra.mxu3 %v2600_v42  ;;  %v2897_v42 = vld [vmem:[%s3251_s3 + $0x30] sm:$0xff] }
  0xbc   :  { %1575 = vmatpush.bf16.msra.mxu1 %v2580_v33 }
  0xbd   :  { %1587 = vmatpush.bf16.msra.mxu2 %v2536_v39  ;;  %1562 = vmatpush.bf16.msra.mxu0 %v2508_v46 }
  0xbf   :  { %1602 = vmatpush.bf16.msra.mxu3 %v2592_v60  ;;  %v2904_v60 = vld [vmem:[%s3251_s3 + $0x68] sm:$0xff] }
  0xc0   :  { %1576 = vmatpush.bf16.msra.mxu1 %v2572_v51 }
  0xc1   :  { %1588 = vmatpush.bf16.msra.mxu2 %v2528_v59  ;;  %v2892_v59 = vld [vmem:[%s3251_s3 + $0x8] sm:$0xff] }
  0xc3   :  { %1603 = vmatpush.bf16.msra.mxu3 %v2584_v62 }
  0xc9   :  { %v3133_v29 = vpop.f32.mrf.mxu0 }
  0xca   :  { %v3135_v30 = vpop.f32.mrf.mxu1  ;;  %v1107_v24 = vadd.f32 %v3133_v29, %v1093_v9  ;;  %v1095_v29 = vadd.f32 %v3138_v32, %v1081_v23  ;;  %v2499_v32 = vld [vmem:[#allocation4] sm:$0xf]  ;;  %v2845_v9 = vld [vmem:[#allocation4 + $0x14] sm:$0xf]  ;;  %v2565_v23 = vld [vmem:[#allocation4 + $0x88] sm:$0xf0] }
  0xcb   :  { %v2500_v2 = vor.u32 %v2844_v0, %v2499_v32  ;;  %v2512_v18 = vor.u32 %v2845_v9, %v2509_v10  ;;  %v2568_v28 = vor.u32 %v2859_v58, %v2565_v23  ;;  %v2891_v32 = vld [vmem:[%s3251_s3] sm:$0xff]  ;;  %v1613_v9 = vperm.slane %v68_v8, 0 }
  0xcc   :  { %v1121_v44 = vadd.f32 %v3135_v30, %v1107_v24  ;;  %v2563_v30 = vld [vmem:[#allocation4 + $0x80] sm:$0xf]  ;;  %v1614_v58 = vperm.slane %v68_v8, 1 }
  0xcd   :  { %v2564_v5 = vor.u32 %v2860_v53, %v2563_v30  ;;  %1563 = vmatpush.bf16.msra.mxu0 %v2500_v2  ;;  %v2903_v0 = vld [vmem:[%s3251_s3 + $0x60] sm:$0xff]  ;;  %v2902_v30 = vld [vmem:[%s3251_s3 + $0x58] sm:$0xff]  ;;  %v2900_v2 = vld [vmem:[%s3251_s3 + $0x48] sm:$0xff] }
  0xcf   :  { %1577 = vmatpush.bf16.msra.mxu1 %v2564_v5 }
  0xd0   :  { %1564 = vmatmul.bf16.vlgmr.msra.gmra.mxu0 %v3043_v41 }
  0xd1   :  { %v3143_v61 = vpop.f32.mrf.mxu2  ;;  %v1108_v6 = vpop.f32.mrf.mxu0 }
  0xd2   :  { %v3147_v11 = vpop.f32.mrf.mxu1  ;;  %v3149_v13 = vpop.f32.mrf.mxu3  ;;  %v1109_v50 = vadd.f32 %v1108_v6, %v1095_v29  ;;  %v1135_v1 = vadd.f32 %v3143_v61, %v1121_v44  ;;  %v2520_v6 = vor.u32 %v2847_v3, %v2517_v4  ;;  %v2573_v61 = vld [vmem:[#allocation4 + $0x98] sm:$0xf0]  ;;  %1578 = vmatmul.bf16.vlgmr.msra.gmra.mxu1 %v3051_v47  ;;  %v2896_v44 = vld [vmem:[%s3251_s3 + $0x28] sm:$0xff]  ;;  %v2899_v4 = vld [vmem:[%s3251_s3 + $0x40] sm:$0xff] }
  0xd4   :  { %v1123_v57 = vadd.f32 %v3147_v11, %v1109_v50  ;;  %v1149_v15 = vadd.f32 %v3149_v13, %v1135_v1  ;;  %1589 = vmatpush.bf16.msra.mxu2 %v2520_v6  ;;  %v2576_v11 = vor.u32 %v2861_v14, %v2573_v61  ;;  %v2504_v13 = vor.u32 %v2843_v21, %v2501_v63  ;;  %v2901_v1 = vld [vmem:[%s3251_s3 + $0x50] sm:$0xff] }
  0xd6   :  { %1604 = vmatpush.bf16.msra.mxu3 %v2576_v11 }
  0xd8   :  { %1590 = vmatpush.bf16.msra.mxu2 %v2512_v18 }
  0xd9   :  { %v1136_v37 = vpop.f32.mrf.mxu2 }
  0xda   :  { %v1150_v56 = vpop.f32.mrf.mxu3  ;;  %v1137_v16 = vadd.f32 %v1136_v37, %v1123_v57  ;;  %1605 = vmatpush.bf16.msra.mxu3 %v2568_v28  ;;  %v2898_v37 = vld [vmem:[%s3251_s3 + $0x38] sm:$0xff] }
  0xdb   :  { %1770 = vmatpush.bf16.msrb.mxu0 %v2898_v37  ;;  %v2908_v37 = vld [vmem:[%s3251_s3 + $0x88] sm:$0xff] }
  0xdc   :  { %v1151_v24 = vadd.f32 %v1150_v56, %v1137_v16  ;;  %1591 = vmatpush.bf16.msra.mxu2 %v2504_v13  ;;  %v2906_v56 = vld [vmem:[%s3251_s3 + $0x78] sm:$0xff] }
  0xdd   :  { %1784 = vmatpush.bf16.msrb.mxu1 %v2906_v56 }
  0xdf   :  { %1771 = vmatpush.bf16.msrb.mxu0 %v2897_v42 }
  0xe3   :  { %1772 = vmatpush.bf16.msrb.mxu0 %v2896_v44 }
  0xe7   :  { %1773 = vmatpush.bf16.msrb.mxu0 %v2895_v54 }
  0xe9   :  { %v1162_v38 = vpop.f32.mrf.mxu0 }
  0xea   :  { %v1176_v45 = vpop.f32.mrf.mxu1  ;;  %v1163_v19 = vadd.f32 %v1162_v38, %v1149_v15 }
  0xeb   :  { %1774 = vmatpush.bf16.msrb.mxu0 %v2894_v55  ;;  %v2921_v55 = vld [vmem:[%s3252_s4 + $0x4] ss:$0 sm:$0xff] }
  0xec   :  { %v1177_v26 = vadd.f32 %v1176_v45, %v1163_v19 }
  0xf1   :  { %v1190_v12 = vpop.f32.mrf.mxu2  ;;  %v1164_v17 = vpop.f32.mrf.mxu0 }
  0xf2   :  { %v1178_v20 = vpop.f32.mrf.mxu1  ;;  %v1204_v22 = vpop.f32.mrf.mxu3  ;;  %v1165_v27 = vadd.f32 %v1164_v17, %v1151_v24  ;;  %v1191_v31 = vadd.f32 %v1190_v12, %v1177_v26 }
  0xf4   :  { %v1179_v35 = vadd.f32 %v1178_v20, %v1165_v27  ;;  %v1205_v38 = vadd.f32 %v1204_v22, %v1191_v31 }
  0xf9   :  { %v1192_v33 = vpop.f32.mrf.mxu2 }
  0xfa   :  { %v1193_v39 = vadd.f32 %v1192_v33, %v1179_v35  ;;  %v1206_v43 = vpop.f32.mrf.mxu3  ;;  %v2910_v35 = vld [vmem:[%s3251_s3 + $0x98] sm:$0xff] }
  0xfc   :  { %v1207_v29 = vadd.f32 %v1206_v43, %v1193_v39  ;;  %v2912_v39 = vld [vmem:[%s3251_s3 + $0xa8] sm:$0xff] }
 0x109   :  { %v1218_v34 = vpop.f32.mrf.mxu0 }
 0x10a   :  { %v1232_v36 = vpop.f32.mrf.mxu1  ;;  %v1219_v25 = vadd.f32 %v1218_v34, %v1205_v38  ;;  %v2907_v38 = vld [vmem:[%s3251_s3 + $0x80] sm:$0xff] }
 0x10c   :  { %v1233_v46 = vadd.f32 %v1232_v36, %v1219_v25  ;;  %v2909_v36 = vld [vmem:[%s3251_s3 + $0x90] sm:$0xff]  ;;  %v2920_v25 = vld [vmem:[%s3252_s4 + $0x3] ss:$0 sm:$0xff] }
 0x10e   :  { %v1237_v50 = vmax.f32 %v1233_v46, 0.0 }
 0x111   :  { %v1220_v45 = vpop.f32.mrf.mxu0 }
 0x112   :  { %v1221_v48 = vadd.f32 %v1220_v45, %v1207_v29  ;;  %v1234_v49 = vpop.f32.mrf.mxu1 }
 0x114   :  { %v1235_v40 = vadd.f32 %v1234_v49, %v1221_v48 }
 0x116   :  { %v1238_v51 = vmax.f32 %v1235_v40, 0.0 }
 0x118   :  { %v1271_v52 = vpack.c.bf16 %v1238_v51, %v1237_v50 }
 0x11a   :  { %1376 = vmatmul.bf16.vlgmr.msrb.gmra.mxu2 %v1271_v52  ;;  %1390 = vmatmul.bf16.vlgmr.msrb.gmra.mxu3 %v1271_v52  ;;  %v2911_v52 = vld [vmem:[%s3251_s3 + $0xa0] sm:$0xff] }
 0x11b   :  { %1836 = vmatpush.bf16.msrb.mxu2 %v2910_v35  ;;  %1874 = vmatpush.bf16.msrb.mxu3 %v2912_v39 }
 0x11f   :  { %1837 = vmatpush.bf16.msrb.mxu2 %v2909_v36  ;;  %1875 = vmatpush.bf16.msrb.mxu3 %v2911_v52 }
 0x123   :  { %1838 = vmatpush.bf16.msrb.mxu2 %v2908_v37 }
 0x127   :  { %1839 = vmatpush.bf16.msrb.mxu2 %v2907_v38 }
 0x12a   :  { %1592 = vmatmul.bf16.vlgmr.msra.gmra.mxu2 %v3043_v41  ;;  %1606 = vmatmul.bf16.vlgmr.msra.gmra.mxu3 %v3051_v47  ;;  %v2893_v41 = vld [vmem:[%s3251_s3 + $0x10] sm:$0xff] }
 0x12b   :  { %v2905_v47 = vld [vmem:[%s3251_s3 + $0x70] sm:$0xff]  ;;  %1775 = vmatpush.bf16.msrb.mxu0 %v2893_v41 }
 0x12c   :  { %1785 = vmatpush.bf16.msrb.mxu1 %v2905_v47 }
 0x12f   :  { %1776 = vmatpush.bf16.msrb.mxu0 %v2892_v59 }
 0x130   :  { %1786 = vmatpush.bf16.msrb.mxu1 %v2904_v60 }
 0x133   :  { %1777 = vmatpush.bf16.msrb.mxu0 %v2891_v32 }
 0x134   :  { %1787 = vmatpush.bf16.msrb.mxu1 %v2903_v0  ;;  %v2922_v0 = vld [vmem:[%s3252_s4 + $0x5] ss:$0 sm:$0xff] }
 0x138   :  { %1788 = vmatpush.bf16.msrb.mxu1 %v2902_v30 }
 0x13c   :  { %1789 = vmatpush.bf16.msrb.mxu1 %v2901_v1 }
 0x140   :  { %1790 = vmatpush.bf16.msrb.mxu1 %v2900_v2 }
 0x144   :  { %1791 = vmatpush.bf16.msrb.mxu1 %v2899_v4 }
 0x14d   :  { %v1565_v53 = vpop.f32.mrf.mxu0 }
 0x14f   :  { %v1579_v3 = vpop.f32.mrf.mxu1 }
 0x155   :  { %v1567_v57 = vpop.f32.mrf.mxu0 }
 0x157   :  { %v1581_v10 = vpop.f32.mrf.mxu1 }
 0x19d   :  { %v1377_v5 = vpop.f32.mrf.mxu2  ;;  %v1391_v6 = vpop.f32.mrf.mxu3 }
 0x19e   :  { %v1566_v7 = vadd.f32 %v1565_v53, %v1377_v5 }
 0x1a0   :  { %v1580_v62 = vadd.f32 %v1579_v3, %v1566_v7 }
 0x1a2   :  { %v1617_v15 = vadd.f32 %v1613_v9, %v1580_v62 }
 0x1a4   :  { %v1621_v18 = vmax.f32 %v1617_v15, 0.0 }
 0x1a5   :  { %v1379_v12 = vpop.f32.mrf.mxu2  ;;  %v1393_v14 = vpop.f32.mrf.mxu3 }
 0x1a6   :  { %v1568_v61 = vadd.f32 %v1567_v57, %v1379_v12 }
 0x1a8   :  { %v1582_v16 = vadd.f32 %v1581_v10, %v1568_v61 }
 0x1aa   :  { %v1619_v17 = vadd.f32 %v1613_v9, %v1582_v16 }
 0x1ac   :  { %v1623_v19 = vmax.f32 %v1619_v17, 0.0 }
 0x1ad   :  { %v1593_v20 = vpop.f32.mrf.mxu2  ;;  %v1607_v11 = vpop.f32.mrf.mxu3 }
 0x1ae   :  { %v1669_v21 = vpack.c.bf16 %v1623_v19, %v1621_v18  ;;  %v1594_v63 = vadd.f32 %v1593_v20, %v1391_v6 }
 0x1b0   :  { %1778 = vmatmul.bf16.vlgmr.msrb.gmra.mxu0 %v1669_v21  ;;  %v1608_v22 = vadd.f32 %v1607_v11, %v1594_v63 }
 0x1b2   :  { %v1618_v26 = vadd.f32 %v1614_v58, %v1608_v22 }
 0x1b4   :  { %v1622_v31 = vmax.f32 %v1618_v26, 0.0 }
 0x1b5   :  { %v1595_v23 = vpop.f32.mrf.mxu2  ;;  %v1609_v13 = vpop.f32.mrf.mxu3 }
 0x1b6   :  { %v1596_v24 = vadd.f32 %v1595_v23, %v1393_v14 }
 0x1b8   :  { %v1610_v27 = vadd.f32 %v1609_v13, %v1596_v24 }
 0x1ba   :  { %v1620_v28 = vadd.f32 %v1614_v58, %v1610_v27 }
 0x1bc   :  { %v1624_v33 = vmax.f32 %v1620_v28, 0.0 }
 0x1be   :  { %v1670_v34 = vpack.c.bf16 %v1624_v33, %v1622_v31 }
 0x1c0   :  { %1792 = vmatmul.bf16.vlgmr.msrb.gmra.mxu1 %v1670_v34 }
 0x22d   :  { %v1779_v42 = vpop.f32.mrf.mxu0 }
 0x22e   :  { %v1780_v44 = vadd.f32 %v2920_v25, %v1779_v42 }
 0x235   :  { %v1781_v29 = vpop.f32.mrf.mxu0 }
 0x236   :  { %v1782_v45 = vadd.f32 %v2920_v25, %v1781_v29 }
 0x23d   :  { %v1793_v43 = vpop.f32.mrf.mxu1 }
 0x23e   :  { %v1794_v46 = vadd.f32 %v1793_v43, %v1780_v44 }
 0x240   :  { %v1798_v40 = vmax.f32 %v1794_v46, 0.0 }
 0x245   :  { %v1795_v48 = vpop.f32.mrf.mxu1 }
 0x246   :  { %v1796_v49 = vadd.f32 %v1795_v48, %v1782_v45 }
 0x248   :  { %v1799_v50 = vmax.f32 %v1796_v49, 0.0 }
 0x24a   :  { %v1800_v51 = vpack.c.bf16 %v1799_v50, %v1798_v40 }
 0x24c   :  { %2705 = vmatmul.msk.bf16.vlgmr.msrb.gmra.mxu2 %vm1828_vm0, %v1800_v51 }
 0x2cf   :  { %v1841_v54 = vpop.f32.mrf.mxu2 }
 0x2d0   :  { %v1842_v56 = vadd.f32 %v2921_v55, %v1841_v54 }
 0x2d2   :  { %v1846_v59 = vmax.f32 %v1842_v56, 0.0 }
 0x2d7   :  { %v1843_v41 = vpop.f32.mrf.mxu2 }
 0x2d8   :  { %v1844_v47 = vadd.f32 %v2921_v55, %v1843_v41 }
 0x2da   :  { %v1847_v60 = vmax.f32 %v1844_v47, 0.0 }
 0x2dc   :  { %v1848_v32 = vpack.c.bf16 %v1847_v60, %v1846_v59 }
 0x2de   :  { %2714 = vmatmul.msk.bf16.vlgmr.msrb.gmra.mxu3 %vm1864_vm1, %v1848_v32 }
 0x361   :  { %v1877_v30 = vpop.f32.mrf.mxu3 }
 0x362   :  { %v1878_v1 = vadd.f32 %v2922_v0, %v1877_v30 }
 0x364   :  { %v2715_v2 = vmul.f32 -1.442695, %v1878_v1 }
 0x366   :  { %2923 = vpow2.f32 %v2715_v2 }
 0x369   :  { %v1879_v53 = vpop.f32.mrf.mxu3 }
 0x36a   :  { %v1880_v3 = vadd.f32 %v2922_v0, %v1879_v53 }
 0x36c   :  { %v2924_v4 = vpop.eup %2923  ;;  %v2716_v5 = vmul.f32 -1.442695, %v1880_v3 }
 0x36d   :  { %v1888_v6 = vadd.f32 1.0, %v2924_v4 }
 0x36e   :  { %2925 = vpow2.f32 %v2716_v5 }
 0x36f   :  { %2927 = vrcp.f32 %v1888_v6  ;;  %v1901_v10 = vand.u32 2147483648, %v1888_v6  ;;  %v1899_v14 = vand.u32 2147483647, %v1888_v6  ;;  %vm1895_vm3 = vweird.f32 %v1888_v6 }
 0x371   :  { %v1902_v16 = vor.u32 1.1754944e-38, %v1901_v10  ;;  %vm1900_vm6 = vcmp.eq.f32.partialorder %v1899_v14, 8.507059e+37 }
 0x374   :  { %v2926_v7 = vpop.eup %2925 }
 0x375   :  { %v2928_v8 = vpop.eup %2927  ;;  %v1889_v57 = vadd.f32 1.0, %v2926_v7 }
 0x376   :  { %v1891_v62 = vmul.f32 %v2928_v8, %v1888_v6  ;;  %vm1896_vm2 = vweird.f32 %v2928_v8 }
 0x377   :  { %2929 = vrcp.f32 %v1889_v57  ;;  %vm1897_vm4 = vmor %vm1895_vm3, %vm1896_vm2  ;;  %v1916_v11 = vand.u32 2147483648, %v1889_v57  ;;  %v1914_v63 = vand.u32 2147483647, %v1889_v57  ;;  %vm1910_vm8 = vweird.f32 %v1889_v57 }
 0x378   :  { %v1892_v9 = vsub.f32 1.0, %v1891_v62 }
 0x379   :  { %v1917_v58 = vor.u32 1.1754944e-38, %v1916_v11  ;;  %vm1915_vm10 = vcmp.eq.f32.partialorder %v1914_v63, 8.507059e+37 }
 0x37a   :  { %v1893_v12 = vmul.f32 %v2928_v8, %v1892_v9 }
 0x37c   :  { %v1894_v61 = vadd.f32 %v2928_v8, %v1893_v12 }
 0x37d   :  { %v2930_v15 = vpop.eup %2929 }
 0x37e   :  { %v1898_v17 = vsel %vm1897_vm4, %v2928_v8, %v1894_v61  ;;  %v1906_v18 = vmul.f32 %v2930_v15, %v1889_v57  ;;  %vm1911_vm7 = vweird.f32 %v2930_v15 }
 0x37f   :  { %v1903_v19 = vsel %vm1900_vm6, %v1902_v16, %v1898_v17  ;;  %vm1912_vm9 = vmor %vm1910_vm8, %vm1911_vm7 }
 0x380   :  { %1921 = vst.msk [vmem:[%s3253_s5] sm:$0xff] %vm1920_vm5, %v1903_v19  ;;  %v1907_v20 = vsub.f32 1.0, %v1906_v18 }
 0x382   :  { %v1908_v21 = vmul.f32 %v2930_v15, %v1907_v20 }
 0x384   :  { %v1909_v22 = vadd.f32 %v2930_v15, %v1908_v21 }
 0x386   :  { %v1913_v23 = vsel %vm1912_vm9, %v2930_v15, %v1909_v22 }
 0x387   :  { %v1918_v24 = vsel %vm1915_vm10, %v1917_v58, %v1913_v23 }
 0x388   :  { %1922 = vst.msk [vmem:[%s3253_s5 + $0x8] sm:$0xff] %vm1920_vm5, %v1918_v24 }
 0x389   :  { %1927 = vsyncpa [#allocation3], 1 }
 0x38a   :  { %1928 = vsyncpa [#allocation5], 1 }

</bundles_post_ra>
